<compile_context>
chip_gen: v7x
topology: tpu7x:2x2x1
jax: 0.10.0
libtpu: 0.0.40
codegen_flags: <defaults>
</compile_context>

<pallas_src>
import jax
import jax.numpy as jnp
from jax.experimental import pallas as pl
from jax.experimental.pallas import tpu as pltpu


def bbox_head_kernel(x_ref, w_ref, b_ref, o_ref):
    # x_ref: (Cin, t_hw)   w_ref: (Cout, Cin)   b_ref: (1, Cout)
    # o_ref: (t_hw, Cout)  -- NHWC layout, contiguous write-back to HBM.
    acc = jax.lax.dot_general(
        x_ref[...], w_ref[...],
        dimension_numbers=(((0,), (1,)), ((), ())),   # contract Cin
        preferred_element_type=jnp.float32,
        precision=jax.lax.Precision.HIGHEST,
    )
    o_ref[...] = (acc + b_ref[...]).astype(o_ref.dtype)


def _pick_hw_tile(hw, n_batch, cin, cout, itemsize, *,
                  target=8192, min_total_steps=2, max_block_bytes=12 << 20):
    """Pick the HW tile (lane axis of the input block).

    Largest multiple of 128 <= target, shrunk so that
      (a) one block's in+out bytes stay <= max_block_bytes (double-buffered by
          the pipeline -> ~2x this in flight, safe on v7x's 64 MiB VMEM), and
      (b) the grid has at least `min_total_steps` steps so both v7x
          TensorCores get work.
    If HW <= 128 just use the full extent (allowed by the (8,128) rule).
    """
    if hw <= 128:
        return hw
    t = min(target, hw)
    t -= t % 128
    t = max(t, 128)
    while t > 128 and (cin + cout) * t * itemsize > max_block_bytes:
        t -= 128
    while t > 128 and n_batch * pl.cdiv(hw, t) < min_total_steps:
        half = t // 2
        t = max(128, half - (half % 128))
    return t


def bbox_head_forward(x_nchw, weight, bias, num_anchors, *,
                      t_hw_target=8192, small_bytes_threshold=1 << 18,
                      force_pallas=False):
    """x_nchw: (N, Cin, H, W); weight: (Cout, Cin) [torch conv weight squeezed];
    bias: (Cout,).  Returns (N, H*W*num_anchors, 4) == BboxHead.forward."""
    N, Cin, H, W = x_nchw.shape
    Cout = weight.shape[0]
    assert Cout == num_anchors * 4
    HW = H * W
    itemsize = jnp.dtype(x_nchw.dtype).itemsize

    total_bytes = N * HW * (Cin + Cout) * itemsize
    if not force_pallas and total_bytes < small_bytes_threshold:
        # Tiny FPN level: pallas_call fixed cost dominates; let XLA fuse it.
        out = jnp.einsum("nchw,oc->nhwo", x_nchw, weight,
                         precision=jax.lax.Precision.HIGHEST) + bias
        return out.reshape(N, HW * num_anchors, 4)

    x_flat = x_nchw.reshape(N, Cin, HW)     # free view of contiguous NCHW
    b2d = bias.reshape(1, Cout)             # broadcasts over the t_hw rows

    t_hw = _pick_hw_tile(HW, N, Cin, Cout, itemsize, target=t_hw_target)
    grid = (N, pl.cdiv(HW, t_hw))           # ragged last block is padded

    # Scoped-VMEM budget: double-buffered in+out blocks plus slack.  v5e's
    # default is only 16 MiB; keep the cap <= 40 MiB so v7x (64 MiB physical)
    # always has headroom.
    per_block_bytes = (Cin + Cout) * t_hw * itemsize
    vmem_limit = int(min(max(3 * per_block_bytes + (2 << 20), 32 << 20),
                         40 << 20))

    cost = pl.CostEstimate(
        flops=2 * N * HW * Cin * Cout,
        transcendentals=0,
        bytes_accessed=total_bytes
        + weight.size * jnp.dtype(weight.dtype).itemsize
        + bias.size * jnp.dtype(bias.dtype).itemsize,
    )

    out_nhwc = pl.pallas_call(
        bbox_head_kernel,
        out_shape=jax.ShapeDtypeStruct((N, HW, Cout), x_nchw.dtype),
        grid_spec=pltpu.PrefetchScalarGridSpec(
            num_scalar_prefetch=0,
            grid=grid,
            in_specs=[
                # activation tile: (Cin, t_hw), batch dim squeezed out
                pl.BlockSpec((pl.Squeezed(), Cin, t_hw),
                             lambda n, j: (n, 0, j)),
                # weight / bias: whole (tiny) arrays, broadcast over the grid
                pl.BlockSpec((Cout, Cin), lambda n, j: (0, 0)),
                pl.BlockSpec((1, Cout), lambda n, j: (0, 0)),
            ],
            # NHWC output written directly by the kernel (no extra HBM pass);
            # (t_hw, Cout) block is contiguous in the (N, HW, Cout) buffer.
            out_specs=pl.BlockSpec((pl.Squeezed(), t_hw, Cout),
                                   lambda n, j: (n, j, 0)),
        ),
        compiler_params=pltpu.CompilerParams(
            dimension_semantics=("parallel", "parallel"),
            vmem_limit_bytes=vmem_limit),
        cost_estimate=cost,
    )(x_flat, weight, b2d)

    # Pure view: (N, HW, A*4) -> (N, HW*A, 4), identical to
    # permute(0,2,3,1).contiguous().view(N, -1, 4).
    return out_nhwc.reshape(N, HW * num_anchors, 4)


if __name__ == "__main__":
    key = jax.random.PRNGKey(0)

    def ref_bbox(x, w, b, a):
        n, _, h, wd = x.shape
        r = jnp.einsum("nchw,oc->nhwo", x, w,
                       precision=jax.lax.Precision.HIGHEST) + b
        return r.reshape(n, h * wd * a, 4)

    # Case 1: small config consistent with the module (scaled-down channels),
    # HW a multiple of 128; force the Pallas path so the kernel is exercised.
    N, Cin, H, W, A = 2, 32, 16, 16, 3
    k1, k2, k3, key = jax.random.split(key, 4)
    x = jax.random.normal(k1, (N, Cin, H, W), dtype=jnp.float32)
    weight = jax.random.normal(k2, (A * 4, Cin), dtype=jnp.float32) * 0.05
    bias = jax.random.normal(k3, (A * 4,), dtype=jnp.float32) * 0.05

    out = jax.block_until_ready(
        bbox_head_forward(x, weight, bias, A, force_pallas=True))
    assert out.shape == (N, H * W * A, 4), out.shape
    assert jnp.allclose(out, ref_bbox(x, weight, bias, A),
                        atol=1e-4, rtol=1e-4)

    # Case 2: ragged HW (19*21 = 399, not a multiple of 128) exercises the
    # cdiv grid + padded last tile (out-of-bounds rows dropped on write-back).
    k1, key = jax.random.split(key)
    x2 = jax.random.normal(k1, (1, Cin, 19, 21), dtype=jnp.float32)
    out2 = jax.block_until_ready(
        bbox_head_forward(x2, weight, bias, A, force_pallas=True))
    assert out2.shape == (1, 19 * 21 * A, 4), out2.shape
    assert jnp.allclose(out2, ref_bbox(x2, weight, bias, A),
                        atol=1e-4, rtol=1e-4)

    # Case 3: default dispatch on a tiny level -> fused-XLA fast path.
    out3 = jax.block_until_ready(bbox_head_forward(x, weight, bias, A))
    assert jnp.allclose(out3, ref_bbox(x, weight, bias, A),
                        atol=1e-4, rtol=1e-4)

    print("KERNEL_OK")
</pallas_src>

<mosaic_0001>
module attributes {stable_mosaic.version = 11 : i64} {
  func.func @bbox_head_kernel(%arg0: i32, %arg1: i32, %arg2: memref<1x32x256xf32, #tpu.memory_space<vmem>>, %arg3: memref<12x32xf32, #tpu.memory_space<vmem>>, %arg4: memref<1x12xf32, #tpu.memory_space<vmem>>, %arg5: memref<1x256x12xf32, #tpu.memory_space<vmem>>) attributes {dimension_semantics = [#tpu.dimension_semantics<parallel>, #tpu.dimension_semantics<parallel>], iteration_bounds = array<i64: 2, 1>, scalar_prefetch = 0 : i64, scratch_operands = 0 : i64, tpu.core_type = #tpu.core_type<tc>, window_params = [{transform_indices = @transform_0, window_bounds = array<i64: 1, 32, 256>}, {pipeline_mode = #tpu.pipeline_mode<synchronous>, transform_indices = @transform_1, window_bounds = array<i64: 12, 32>}, {pipeline_mode = #tpu.pipeline_mode<synchronous>, transform_indices = @transform_2, window_bounds = array<i64: 1, 12>}, {transform_indices = @transform_3, window_bounds = array<i64: 1, 256, 12>}]} {
    %c0 = arith.constant 0 : index
    %c0_0 = arith.constant 0 : index
    %c0_1 = arith.constant 0 : index
    %0 = vector.load %arg2[%c0, %c0_0, %c0_1] : memref<1x32x256xf32, #tpu.memory_space<vmem>>, vector<1x32x256xf32>
    %1 = vector.shape_cast %0 : vector<1x32x256xf32> to vector<32x256xf32>
    %c0_2 = arith.constant 0 : index
    %c0_3 = arith.constant 0 : index
    %2 = vector.load %arg3[%c0_2, %c0_3] : memref<12x32xf32, #tpu.memory_space<vmem>>, vector<12x32xf32>
    %cst = arith.constant dense<0.000000e+00> : vector<256x12xf32>
    %3 = tpu.matmul %1, %2, %cst {dimension_numbers = #tpu.dot_dimension_numbers<[0], [1], [1], [0], [0, 1, 1, 0], [], []>, precision = #tpu.contract_precision<fp32>} : vector<32x256xf32>, vector<12x32xf32>, vector<256x12xf32> -> vector<256x12xf32>
    %c0_4 = arith.constant 0 : index
    %c0_5 = arith.constant 0 : index
    %4 = vector.load %arg4[%c0_4, %c0_5] : memref<1x12xf32, #tpu.memory_space<vmem>>, vector<1x12xf32>
    %5 = vector.broadcast %4 : vector<1x12xf32> to vector<256x12xf32>
    %6 = arith.addf %3, %5 : vector<256x12xf32>
    %c0_6 = arith.constant 0 : index
    %c0_7 = arith.constant 0 : index
    %c0_8 = arith.constant 0 : index
    %7 = vector.load %arg5[%c0_6, %c0_7, %c0_8] : memref<1x256x12xf32, #tpu.memory_space<vmem>>, vector<1x256x12xf32>
    %8 = vector.shape_cast %7 : vector<1x256x12xf32> to vector<256x12xf32>
    %9 = vector.shape_cast %6 : vector<256x12xf32> to vector<1x256x12xf32>
    tpu.vector_store %arg5[%c0_6, %c0_7, %c0_8], %9 {strides = array<i32>} : memref<1x256x12xf32, #tpu.memory_space<vmem>>, vector<1x256x12xf32>,
    return
  }
  func.func @transform_0(%arg0: i32, %arg1: i32) -> (i32, i32, i32) {
    %c0_i32 = arith.constant 0 : i32
    %c0_i32_0 = arith.constant 0 : i32
    return %arg0, %c0_i32, %arg1 : i32, i32, i32
  }
  func.func @transform_1(%arg0: i32, %arg1: i32) -> (i32, i32) {
    %c0_i32 = arith.constant 0 : i32
    %c0_i32_0 = arith.constant 0 : i32
    %c0_i32_1 = arith.constant 0 : i32
    return %c0_i32, %c0_i32_0 : i32, i32
  }
  func.func @transform_2(%arg0: i32, %arg1: i32) -> (i32, i32) {
    %c0_i32 = arith.constant 0 : i32
    %c0_i32_0 = arith.constant 0 : i32
    %c0_i32_1 = arith.constant 0 : i32
    return %c0_i32, %c0_i32_0 : i32, i32
  }
  func.func @transform_3(%arg0: i32, %arg1: i32) -> (i32, i32, i32) {
    %c0_i32 = arith.constant 0 : i32
    %c0_i32_0 = arith.constant 0 : i32
    return %arg0, %arg1, %c0_i32 : i32, i32, i32
  }
}

</mosaic_0001>

<bundles_post_ra>
// kernel: tpu_custom_call.1
= control target key start
LH: loop header
LB: loop body
LE: loop exit
PB: predicated region body
PF: predicated region fallthrough
CT: control target
= control target key end

     0   :  { %8 = vsyncpa [#allocation3], 0  ;;  %s4004_s0 = inlined_call_operand.hbm [shape: f32[2,32,256], index: 0, kind: input, shape index: {}]   ;;  %s4005_s1 = inlined_call_operand.hbm [shape: f32[12,32], index: 1, kind: input, shape index: {}]   ;;  %s4006_s2 = inlined_call_operand.vmem [shape: f32[1,12], index: 2, kind: input, shape index: {}]   ;;  %s4007_s3 = inlined_call_operand.vmem [shape: f32[2,256,12], index: 3, kind: output, shape index: {}]  }
   0x1   :  { %10 = vsyncpa [#allocation3 + $0x1], 0 }
   0x2   :  { %11 = vsyncpa [#allocation5], 0  ;;  %s3309_s12 = smov 0   ;;  %s3311_s13 = smov 0  }
   0x3   :  { %s3313_s14 = smov 0   ;;  %s3315_s15 = smov 0  }
   0x4   :  { %s3317_s16 = smov 0   ;;  %s3319_s17 = smov 0  }
   0x5 LB: > { %s2348_s18 = sadd.s32 4294967295, %s3281_s17   ;;  %p51_p0 = scmp.ne.s32.totalorder %s3265_s13, %s3261_s12  ;;  %s3281_s17 = sphi %s3319_s17, %s17_s17   ;;  %s3277_s16 = sphi %s3317_s16, %s4078_s16   ;;  %s3273_s15 = sphi %s3315_s15, %s4077_s15   ;;  %s3269_s14 = sphi %s3313_s14, %s4076_s14   ;;  %s3265_s13 = sphi %s3311_s13, %s4075_s13   ;;  %s3261_s12 = sphi %s3309_s12, %s4074_s12  }
   0x6   : > { %p3339_p1 = scmp.eq.s32.totalorder %s2348_s18, 0  ;;  %p2350_p2 = scmp.ge.s32.totalorder %s3281_s17, 1 }
   0x7   : > { %p132_p3 = scmp.lt.s32.totalorder %s3281_s17, 3  ;;  %s3283_s22 = smov [#allocation4]  }
   0x8   : > { %s4030_s19 = scalar_select %p3339_p1, 1, 0 }
   0x9   : > { %p3347_p4 = por %p3339_p1, %p51_p0  ;;  %p3351_p5 = pnand %p2350_p2, %p132_p3 }
   0xa   : > { %s144_s23 = sshll.u32 %s3283_s22, 4  ;;  %s29_s25 = sadd.s32 1, %s3277_s16  ;;  %s145_s23 = int_to_ptr.vmem [resolvable:$true] %s144_s23 }
   0xb   : > { %s4031_s20 = scalar_select %p3347_p4, 1, 0 }
   0xc   : > { %s4032_s21 = scalar_select %p3351_p5, 1, 0 }
   0xd   : > { %p3104_p6 = pneg %p3351_p5  ;;  %s3169_s28 = scalar_lea.hbm %s4005_s1, 256 }
   0xe   : > { %p3170_p8 = scmp.ne.s32.totalorder %s4005_s1, %s3169_s28  ;;  %p3176_p12 = scmp.lt.u32.totalorder %s3169_s28, %s4005_s1 }
   0xf   : > { %p3359_p7 = pnand %p3104_p6, %p3339_p1 }
  0x11   : > { %p3171_p9 = pneg %p3359_p7 }
  0x13   : > { %p3172_p10 = pnand %p3171_p9, %p3170_p8 }
  0x15   : > { %p3173_p11 = pneg %p3172_p10 }
  0x17   : > { %p3178_p13 = pnand %p3176_p12, %p3173_p11 }
  0x19   : > { %3181 = shalt.err (!%p3178_p13)
}
  0x1a   : > { %s3182_s6 = scalar_lea.vmem %s145_s23, 256  ;;  %p3190_p6 = scmp.lt.s32.totalorder %s145_s23, %s145_s23 }
  0x1b   : > { %p3183_p0 = scmp.ne.s32.totalorder %s145_s23, %s3182_s6  ;;  %p3191_p1 = scmp.lt.s32.totalorder %s3182_s6, %s3182_s6 }
  0x1d   : > { %p3185_p2 = pnand %p3183_p0, %p3171_p9  ;;  %p3192_p4 = por %p3191_p1, %p3190_p6 }
  0x1f   : > { %p3186_p3 = pneg %p3185_p2 }
  0x21   : > { %p3193_p5 = pnand %p3192_p4, %p3186_p3 }
  0x23   : > { %3196 = shalt.err (!%p3193_p5)
}
  0x24   : > { %s3284_s7 = smov 128   ;;  %s3285_s8 = smov 8  }
  0x25   : > { %3107 = dma.hbm_to_vmem [thread:$0]  (!%p3359_p7), %s4005_s1, 256, %s145_s23, [#allocation5], %s3284_s7, %s3284_s7, %s3285_s8  }
  0x26   : > { %p31_p1 = scmp.ge.s32.totalorder %s29_s25, 2  ;;  %s38_s11 = sadd.s32 1, %s3269_s14 }
  0x27   : > { %p45_p4 = scmp.ne.s32.totalorder %s3269_s14, %s3265_s13  ;;  %p46_p5 = scmp.eq.s32.totalorder %s3281_s17, 0 }
  0x28   : > { %s4080_s25 = smov (%p31_p1, %s29_s25), 0  ;;  %p3113_p9 = scmp.lt.s32.totalorder %s3281_s17, 2 }
  0x29   : > { %p47_p8 = por %p46_p5, %p45_p4  ;;  %s33_s12 = ssub.s32 %s3277_s16, %s4080_s25 }
  0x2a   : > { %s161_s18 = sand.u32 1, %s3269_s14   ;;  %p36_p10 = scmp.eq.s32.totalorder %s33_s12, 0 }
  0x2b   : > { %s2353_s22 = sshll.u32 %s161_s18, 6  ;;  %s2364_s26 = sshll.u32 %s3277_s16, 10 }
  0x2c   : > { %s3392_s27 = scalar_select %p36_p10, %s3269_s14, %s38_s11  }
  0x2d   : > { %s3397_s23 = scalar_lea.hbm %s4004_s0, %s2364_s26  ;;  %s165_s29 = scalar_lea.vmem [#allocation2], %s2353_s22 }
  0x2e   : > { %s174_s30 = sshll.u32 %s165_s29, 4  ;;  %p3399_p7 = pnand %p3113_p9, %p47_p8  ;;  %s3403_s30 = int_to_ptr.vmem [resolvable:$true] %s174_s30 }
  0x2f   : > { %s3405_s5 = scalar_lea.sflag [#allocation3], %s161_s18  ;;  %s3197_s6 = scalar_lea.hbm %s3397_s23, 1024 }
  0x30   : > { %p3198_p11 = scmp.ne.s32.totalorder %s3397_s23, %s3197_s6  ;;  %p3199_p12 = pneg %p3399_p7 }
  0x31   : > { %s3202_s9 = scalar_lea.hbm %s4004_s0, 2048  ;;  %p3203_p2 = scmp.lt.u32.totalorder %s3397_s23, %s4004_s0 }
  0x32   : > { %p3200_p13 = pnand %p3199_p12, %p3198_p11  ;;  %p3204_p3 = scmp.lt.u32.totalorder %s3202_s9, %s3197_s6 }
  0x33   : > { %p3206_p1 = scmp.lt.u32.totalorder %s3197_s6, %s3397_s23 }
  0x34   : > { %p3201_p0 = pneg %p3200_p13  ;;  %p3205_p6 = por %p3204_p3, %p3203_p2 }
  0x36   : > { %p3207_p4 = por %p3206_p1, %p3205_p6 }
  0x38   : > { %p3208_p5 = pnand %p3207_p4, %p3201_p0 }
  0x3a   : > { %3211 = shalt.err (!%p3208_p5)
}
  0x3b   : > { %s3212_s12 = scalar_lea.vmem %s3403_s30, 1024  ;;  %s3286_s18 = smov [#allocation2]  }
  0x3c   : > { %p3213_p8 = scmp.ne.s32.totalorder %s3403_s30, %s3212_s12  ;;  %s3217_s22 = sshll.u32 %s3286_s18, 4  ;;  %s3218_s22 = int_to_ptr.vmem [resolvable:$false] %s3217_s22 }
  0x3d   : > { %s3219_s26 = scalar_lea.vmem %s3218_s22, 2048  ;;  %p3220_p11 = scmp.lt.s32.totalorder %s3403_s30, %s3218_s22 }
  0x3e   : > { %p3215_p9 = pnand %p3213_p8, %p3199_p12  ;;  %p3221_p13 = scmp.lt.s32.totalorder %s3219_s26, %s3212_s12 }
  0x40   : > { %p3216_p10 = pneg %p3215_p9  ;;  %p3222_p2 = por %p3221_p13, %p3220_p11 }
  0x42   : > { %p3223_p3 = pnand %p3222_p2, %p3216_p10 }
  0x44   : > { %3226 = shalt.err (!%p3223_p3)
}
  0x45   : > { %s3287_s24 = smov 256   ;;  %s3288_s28 = smov 16  }
  0x46   : > { %3111 = dma.hbm_to_vmem [thread:$0]  (!%p3399_p7), %s3397_s23, 1024, %s3403_s30, %s3405_s5, %s3287_s24, %s3287_s24, %s3288_s28  }
  0x47   : > { %p4035_p12 = scmp.ne.s32.totalorder %s4032_s21, 0 }
  0x49   : > { %186 = sbr.rel (%p4035_p12) target bundleno = 666 (0x29a), region = 32 }
  0x50   : > { %s188_s29 = sand.u32 1, %s3265_s13   ;;  %p4036_p0 = scmp.ne.s32.totalorder %s4031_s20, 0 }
  0x51   : > { %s2357_s6 = sshll.u32 %s188_s29, 6  ;;  %s189_s7 = scalar_lea.sflag [#allocation3], %s188_s29 }
  0x52   : > { %s192_s8 = scalar_lea.vmem [#allocation2], %s2357_s6 }
  0x53   : > { %3252 = dma.done.wait (%p4036_p0), %s189_s7, 1024  }
  0x54   : > { %3254 = vsyncadd (%p4036_p0), %s189_s7, 4294966272  ;;  %p4037_p6 = scmp.ne.s32.totalorder %s4030_s19, 0 }
  0x56   : > { %3256 = dma.done.wait (%p4037_p6), [#allocation5], 256  }
  0x57   : > { %3258 = vsyncadd (%p4037_p6), [#allocation5], 4294967040  ;;  %v234_v0 = vld [vmem:[%s192_s8] sm:$0xff]  ;;  %vm315_vm0 = vcmask 261120   ;;  %v235_v1 = vld [vmem:[%s192_s8 + $0x8] sm:$0xff]  ;;  %p225_p7 = scmp.lt.s32.totalorder %s3273_s15, 1 }
  0x58   : > { %251 = vxpose.xlu0.b32.start [1/4] (short) %v234_v0, 128  ;;  %v236_v2 = vld [vmem:[%s192_s8 + $0x10] sm:$0xff]  ;;  %283 = vxpose.xlu1.b32.start [1/4] (short) %v235_v1, 128  ;;  %v242_v3 = vld [vmem:[#allocation4] sm:$0xff]  ;;  %v237_v4 = vld [vmem:[%s192_s8 + $0x18] sm:$0xff]  ;;  %vm2210_vm1 = vcmask 97280  }
  0x59   : > { %v243_v5 = vld [vmem:[#allocation4 + $0x8] sm:$0xf]  ;;  %v413_v6 = vsel %vm315_vm0, %v242_v3, 0  ;;  %v238_v10 = vld [vmem:[%s192_s8 + $0x20] sm:$0xff]  ;;  %v240_v13 = vld [vmem:[%s192_s8 + $0x30] sm:$0xff]  ;;  %s4082_s15 = smov (!%p225_p7, %s3273_s15), 1 }
  0x5a   : > { %v416_v7 = vsel %vm315_vm0, %v243_v5, 0  ;;  %v419_v8 = vand.u32 4294901760, %v413_v6  ;;  %v239_v11 = vld [vmem:[%s192_s8 + $0x28] sm:$0xff]  ;;  %v241_v14 = vld [vmem:[%s192_s8 + $0x38] sm:$0xff]  ;;  %s2365_s21 = sshll.u32 %s4082_s15, 8 }
  0x5b   : > { %v422_v9 = vand.u32 4294901760, %v416_v7  ;;  %s3889_s4 = scalar_lea.vmem %s4007_s3, %s2365_s21 }
  0x5c   : > { %252 = vxpose.xlu0.b32.cont [2/4] (short) %v236_v2, 128  ;;  %284 = vxpose.xlu1.b32.cont [2/4] (short) %v237_v4, 128  ;;  %v807_v15 = vsub.f32 %v413_v6, %v419_v8 }
  0x5d   : > { %v3446_v12 = vpack.c.bf16 %v422_v9, %v419_v8  ;;  %v814_v16 = vsub.f32 %v416_v7, %v422_v9 }
  0x5e   : > { %v808_v17 = vand.u32 4294901760, %v807_v15 }
  0x5f   : > { %2895 = vmatprep.subr.bf16.mxu0 %v3446_v12  ;;  %2883 = vmatprep.subr.bf16.mxu1 %v3446_v12  ;;  %v815_v18 = vand.u32 4294901760, %v814_v16  ;;  %v3452_v25 = vpack.c.bf16 %v814_v16, %v807_v15 }
  0x60   : > { %253 = vxpose.xlu0.b32.cont [3/4] (short) %v238_v10, 128  ;;  %285 = vxpose.xlu1.b32.cont [3/4] (short) %v239_v11, 128  ;;  %v809_v19 = vsub.f32 %v807_v15, %v808_v17 }
  0x61   : > { %2897 = vmatpush3.bf16.xpose.msra.mxu0 %v3446_v12  ;;  %2885 = vmatpush3.bf16.xpose.msra.mxu1 %v3446_v12  ;;  %v816_v20 = vsub.f32 %v814_v16, %v815_v18  ;;  %v2898_v21 = vpack.c.bf16 %v815_v18, %v808_v17 }
  0x62   : > { %v810_v22 = vand.u32 4294901760, %v809_v19 }
  0x63   : > { %v817_v23 = vand.u32 4294901760, %v816_v20  ;;  %2899 = vmatprep.subr.bf16.mxu0 %v2898_v21 }
  0x64   : > { %254 = vxpose.xlu0.b32.end [4/4] (short) %v240_v13, 128  ;;  %286 = vxpose.xlu1.b32.end [4/4] (short) %v241_v14, 128 }
  0x65   : > { %v2886_v24 = vpack.c.bf16 %v817_v23, %v810_v22 }
  0x67   : > { %2887 = vmatprep.subr.bf16.mxu1 %v2886_v24 }
  0xd8   : > { %v267_v26 = vpop.trf.xlu0  ;;  %v3455_v28 = vpop.trf.xlu1 }
  0xd9   : > { %v317_v27 = vsel %vm315_vm0, %v267_v26, 0 }
  0xda   : > { %v3457_v29 = vand.u32 4294901760, %v317_v27 }
  0xdc   : > { %v3460_v30 = vsub.f32 %v317_v27, %v3457_v29  ;;  %v268_v31 = vpop.trf.xlu0  ;;  %v3463_v33 = vpop.trf.xlu1 }
  0xdd   : > { %v320_v32 = vsel %vm315_vm0, %v268_v31, 0 }
  0xde   : > { %v3465_v34 = vand.u32 4294901760, %v320_v32  ;;  %v487_v35 = vand.u32 4294901760, %v3460_v30 }
  0xe0   : > { %v3469_v36 = vsub.f32 %v320_v32, %v3465_v34  ;;  %2730 = vmatprep.mubr.f32.mxu0 %v487_v35  ;;  %v269_v37 = vpop.trf.xlu0  ;;  %v488_v38 = vsub.f32 %v3460_v30, %v487_v35  ;;  %v3473_v40 = vpop.trf.xlu1 }
  0xe1   : > { %v323_v39 = vsel %vm315_vm0, %v269_v37, 0 }
  0xe2   : > { %v3475_v41 = vand.u32 4294901760, %v323_v39  ;;  %v489_v42 = vand.u32 4294901760, %v488_v38  ;;  %v497_v43 = vand.u32 4294901760, %v3469_v36 }
  0xe4   : > { %v3479_v44 = vsub.f32 %v323_v39, %v3475_v41  ;;  %2574 = vmatprep.mubr.f32.mxu1 %v489_v42  ;;  %2731 = vmatmul.mubr.f32.vlgmr.msra.gmra.mrb[0].mxu0 %v497_v43  ;;  %v270_v45 = vpop.trf.xlu0  ;;  %v498_v46 = vsub.f32 %v3469_v36, %v497_v43  ;;  %v3483_v48 = vpop.trf.xlu1 }
  0xe5   : > { %v326_v47 = vsel %vm315_vm0, %v270_v45, 0  ;;  %2901 = vmatpush3.bf16.xpose.msra.mxu0 %v2898_v21 }
  0xe6   : > { %v3485_v49 = vand.u32 4294901760, %v326_v47  ;;  %v499_v50 = vand.u32 4294901760, %v498_v46  ;;  %v507_v51 = vand.u32 4294901760, %v3479_v44  ;;  %2903 = vmatprep.subr.bf16.mxu0 %v3446_v12 }
  0xe8   : > { %v3490_v52 = vsub.f32 %v326_v47, %v3485_v49  ;;  %2575 = vmatmul.mubr.f32.vlgmr.msra.gmra.mrb[0].mxu1 %v499_v50  ;;  %2733 = vmatprep.mubr.f32.mxu0 %v507_v51  ;;  %v271_v53 = vpop.trf.xlu0  ;;  %v508_v54 = vsub.f32 %v3479_v44, %v507_v51  ;;  %v3494_v56 = vpop.trf.xlu1 }
  0xe9   : > { %v329_v55 = vsel %vm315_vm0, %v271_v53, 0  ;;  %2889 = vmatpush3.bf16.xpose.msra.mxu1 %v2886_v24 }
  0xea   : > { %v3496_v57 = vand.u32 4294901760, %v329_v55  ;;  %v509_v58 = vand.u32 4294901760, %v508_v54  ;;  %v517_v59 = vand.u32 4294901760, %v3490_v52  ;;  %2891 = vmatprep.subr.bf16.mxu1 %v3452_v25 }
  0xec   : > { %v3501_v60 = vsub.f32 %v329_v55, %v3496_v57  ;;  %2577 = vmatprep.mubr.f32.mxu1 %v509_v58  ;;  %2734 = vmatmul.mubr.f32.gmra.mrb[2].mxu0 %v517_v59  ;;  %v272_v61 = vpop.trf.xlu0  ;;  %v518_v62 = vsub.f32 %v3490_v52, %v517_v59  ;;  %v3505_v0 = vpop.trf.xlu1 }
  0xed   : > { %v332_v63 = vsel %vm315_vm0, %v272_v61, 0 }
  0xee   : > { %v3507_v1 = vand.u32 4294901760, %v332_v63  ;;  %v519_v2 = vand.u32 4294901760, %v518_v62  ;;  %v527_v3 = vand.u32 4294901760, %v3501_v60 }
  0xf0   : > { %v3511_v4 = vsub.f32 %v332_v63, %v3507_v1  ;;  %2578 = vmatmul.mubr.f32.gmra.mrb[2].mxu1 %v519_v2  ;;  %2736 = vmatprep.mubr.f32.mxu0 %v527_v3  ;;  %v273_v5 = vpop.trf.xlu0  ;;  %v528_v6 = vsub.f32 %v3501_v60, %v527_v3  ;;  %v3518_v11 = vpop.trf.xlu1 }
  0xf1   : > { %v335_v7 = vsel %vm315_vm0, %v273_v5, 0 }
  0xf2   : > { %v3515_v8 = vand.u32 4294901760, %v335_v7  ;;  %v529_v9 = vand.u32 4294901760, %v528_v6  ;;  %v537_v10 = vand.u32 4294901760, %v3511_v4 }
  0xf4   : > { %v3521_v13 = vsub.f32 %v335_v7, %v3515_v8  ;;  %2580 = vmatprep.mubr.f32.mxu1 %v529_v9  ;;  %2737 = vmatmul.mubr.f32.gmra.mrb[4].mxu0 %v537_v10  ;;  %v274_v14 = vpop.trf.xlu0  ;;  %v538_v15 = vsub.f32 %v3511_v4, %v537_v10  ;;  %v3532_v23 = vpop.trf.xlu1 }
  0xf5   : > { %v338_v16 = vsel %vm315_vm0, %v274_v14, 0 }
  0xf6   : > { %v3525_v17 = vand.u32 4294901760, %v338_v16  ;;  %v539_v18 = vand.u32 4294901760, %v538_v15  ;;  %v547_v19 = vand.u32 4294901760, %v3521_v13 }
  0xf8   : > { %v3529_v20 = vsub.f32 %v338_v16, %v3525_v17  ;;  %2581 = vmatmul.mubr.f32.gmra.mrb[4].mxu1 %v539_v18  ;;  %2739 = vmatprep.mubr.f32.mxu0 %v547_v19  ;;  %v275_v21 = vpop.trf.xlu0  ;;  %v548_v22 = vsub.f32 %v3521_v13, %v547_v19  ;;  %v3546_v45 = vpop.trf.xlu1  ;;  %v365_v19 = vsel %vm315_vm0, %v3455_v28, 0  ;;  %v371_v28 = vsel %vm315_vm0, %v3473_v40, 0 }
  0xf9   : > { %v341_v24 = vsel %vm315_vm0, %v275_v21, 0 }
  0xfa   : > { %4038 = vst [vmem:[#allocation8_spill] sm:$0xff] %v3529_v20  ;;  %v3535_v26 = vand.u32 4294901760, %v341_v24  ;;  %v549_v27 = vand.u32 4294901760, %v548_v22  ;;  %v557_v31 = vand.u32 4294901760, %v3529_v20 }
  0xfc   : > { %v3539_v32 = vsub.f32 %v341_v24, %v3535_v26  ;;  %2583 = vmatprep.mubr.f32.mxu1 %v549_v27  ;;  %2740 = vmatmul.mubr.f32.gmra.mrb[6].mxu0 %v557_v31  ;;  %v276_v35 = vpop.trf.xlu0  ;;  %v558_v37 = vsub.f32 %v3529_v20, %v557_v31  ;;  %v3560_v62 = vpop.trf.xlu1  ;;  %v368_v31 = vsel %vm315_vm0, %v3463_v33, 0 }
  0xfd   : > { %v344_v38 = vsel %vm315_vm0, %v276_v35, 0  ;;  %v3598_v33 = vand.u32 4294901760, %v368_v31 }
  0xfe   : > { %4039 = vst [vmem:[#allocation9_spill] sm:$0xff] %v3539_v32  ;;  %v3543_v39 = vand.u32 4294901760, %v344_v38  ;;  %v559_v42 = vand.u32 4294901760, %v558_v37  ;;  %v567_v43 = vand.u32 4294901760, %v3539_v32 }
 0x100   : > { %v3549_v46 = vsub.f32 %v344_v38, %v3543_v39  ;;  %2584 = vmatmul.mubr.f32.gmra.mrb[6].mxu1 %v559_v42  ;;  %2742 = vmatprep.mubr.f32.mxu0 %v567_v43  ;;  %v277_v47 = vpop.trf.xlu0  ;;  %v568_v50 = vsub.f32 %v3539_v32, %v567_v43  ;;  %v3574_v18 = vpop.trf.xlu1  ;;  %v3588_v42 = vand.u32 4294901760, %v365_v19 }
 0x101   : > { %v347_v51 = vsel %vm315_vm0, %v277_v47, 0 }
 0x102   : > { %4040 = vst [vmem:[#allocation10_spill] sm:$0xff] %v3549_v46  ;;  %v3553_v53 = vand.u32 4294901760, %v347_v51  ;;  %v569_v54 = vand.u32 4294901760, %v568_v50  ;;  %v577_v55 = vand.u32 4294901760, %v3549_v46 }
 0x104   : > { %v3557_v58 = vsub.f32 %v347_v51, %v3553_v53  ;;  %2586 = vmatprep.mubr.f32.mxu1 %v569_v54  ;;  %2743 = vmatmul.mubr.f32.gmra.mrb[8].mxu0 %v577_v55  ;;  %v278_v59 = vpop.trf.xlu0  ;;  %v578_v61 = vsub.f32 %v3549_v46, %v577_v55  ;;  %v3596_v51 = vpop.trf.xlu1  ;;  %v374_v55 = vsel %vm315_vm0, %v3483_v48, 0 }
 0x105   : > { %v350_v63 = vsel %vm315_vm0, %v278_v59, 0 }
 0x106   : > { %4041 = vst [vmem:[#allocation11_spill] sm:$0xff] %v3557_v58  ;;  %v3563_v2 = vand.u32 4294901760, %v350_v63  ;;  %v579_v3 = vand.u32 4294901760, %v578_v61  ;;  %v587_v5 = vand.u32 4294901760, %v3557_v58 }
 0x108   : > { %v3567_v6 = vsub.f32 %v350_v63, %v3563_v2  ;;  %2587 = vmatmul.mubr.f32.gmra.mrb[8].mxu1 %v579_v3  ;;  %2745 = vmatprep.mubr.f32.mxu0 %v587_v5  ;;  %v279_v7 = vpop.trf.xlu0  ;;  %v588_v9 = vsub.f32 %v3557_v58, %v587_v5  ;;  %v3607_v63 = vsub.f32 %v365_v19, %v3588_v42  ;;  %v3609_v3 = vand.u32 4294901760, %v371_v28 }
 0x109   : > { %v353_v10 = vsel %vm315_vm0, %v279_v7, 0  ;;  %v377_v5 = vsel %vm315_vm0, %v3494_v56, 0  ;;  %v383_v56 = vsel %vm315_vm0, %v3518_v11, 0 }
 0x10a   : > { %4042 = vst [vmem:[#allocation12_spill] sm:$0xff] %v3567_v6  ;;  %v3571_v14 = vand.u32 4294901760, %v353_v10  ;;  %v589_v15 = vand.u32 4294901760, %v588_v9  ;;  %v597_v16 = vand.u32 4294901760, %v3567_v6  ;;  %4045 = vst [vmem:[#allocation15_spill] sm:$0xff] %v3607_v63 }
 0x10c   : > { %v3579_v21 = vsub.f32 %v353_v10, %v3571_v14  ;;  %2589 = vmatprep.mubr.f32.mxu1 %v589_v15  ;;  %2746 = vmatmul.mubr.f32.gmra.mrb[10].mxu0 %v597_v16  ;;  %v280_v22 = vpop.trf.xlu0  ;;  %v598_v24 = vsub.f32 %v3567_v6, %v597_v16  ;;  %v3618_v10 = vsub.f32 %v368_v31, %v3598_v33  ;;  %v3620_v15 = vand.u32 4294901760, %v374_v55 }
 0x10d   : > { %v356_v27 = vsel %vm315_vm0, %v280_v22, 0  ;;  %v380_v16 = vsel %vm315_vm0, %v3505_v0, 0  ;;  %v3633_v31 = vand.u32 4294901760, %v377_v5 }
 0x10e   : > { %4043 = vst [vmem:[#allocation13_spill] sm:$0xff] %v3579_v21  ;;  %v3585_v35 = vand.u32 4294901760, %v356_v27  ;;  %v599_v37 = vand.u32 4294901760, %v598_v24  ;;  %v607_v38 = vand.u32 4294901760, %v3579_v21  ;;  %4047 = vst [vmem:[#allocation17_spill] sm:$0xff] %v3618_v10 }
 0x110   : > { %v3593_v43 = vsub.f32 %v356_v27, %v3585_v35  ;;  %2590 = vmatmul.mubr.f32.gmra.mrb[10].mxu1 %v599_v37  ;;  %2748 = vmatprep.mubr.f32.mxu0 %v607_v38  ;;  %v281_v47 = vpop.trf.xlu0  ;;  %v608_v50 = vsub.f32 %v3579_v21, %v607_v38  ;;  %v311_v37 = vpop.trf.xlu1  ;;  %v3631_v38 = vsub.f32 %v371_v28, %v3609_v3 }
 0x111   : > { %v359_v54 = vsel %vm315_vm0, %v281_v47, 0  ;;  %v647_v47 = vand.u32 4294901760, %v3607_v63  ;;  %v3646_v28 = vsub.f32 %v374_v55, %v3620_v15 }
 0x112   : > { %4044 = vst [vmem:[#allocation14_spill] sm:$0xff] %v3593_v43  ;;  %v3603_v59 = vand.u32 4294901760, %v359_v54  ;;  %v609_v40 = vand.u32 4294901760, %v608_v50  ;;  %v617_v61 = vand.u32 4294901760, %v3593_v43  ;;  %4048 = vst [vmem:[#allocation18_spill] sm:$0xff] %v3631_v38  ;;  %v3640_v50 = vand.u32 4294901760, %v380_v16 }
 0x113   : > { %4050 = vst [vmem:[#allocation20_spill] sm:$0xff] %v3646_v28 }
 0x114   : > { %v3614_v7 = vsub.f32 %v359_v54, %v3603_v59  ;;  %2592 = vmatprep.mubr.f32.mxu1 %v609_v40  ;;  %2749 = vmatmul.mubr.f32.gmra.mrb[12].mxu0 %v617_v61  ;;  %v282_v9 = vpop.trf.xlu0  ;;  %v618_v48 = vsub.f32 %v3593_v43, %v617_v61  ;;  %v3642_v54 = vand.u32 4294901760, %v383_v56  ;;  %v657_v40 = vand.u32 4294901760, %v3618_v10  ;;  %v312_v43 = vpop.trf.xlu1 }
 0x115   : > { %v362_v19 = vsel %vm315_vm0, %v282_v9, 0  ;;  %v386_v61 = vsel %vm315_vm0, %v3532_v23, 0  ;;  %v3660_v23 = vsub.f32 %v380_v16, %v3640_v50 }
 0x116   : > { %4046 = vst [vmem:[#allocation16_spill] sm:$0xff] %v3614_v7  ;;  %v3627_v22 = vand.u32 4294901760, %v362_v19  ;;  %v619_v24 = vand.u32 4294901760, %v618_v48  ;;  %v627_v27 = vand.u32 4294901760, %v3614_v7 }
 0x117   : > { %4052 = vst [vmem:[#allocation22_spill] sm:$0xff] %v3660_v23 }
 0x118   : > { %v3637_v0 = vsub.f32 %v362_v19, %v3627_v22  ;;  %2593 = vmatmul.mubr.f32.gmra.mrb[12].mxu1 %v619_v24  ;;  %2751 = vmatprep.mubr.f32.mxu0 %v627_v27  ;;  %v628_v11 = vsub.f32 %v3614_v7, %v627_v27  ;;  %v3652_v19 = vsub.f32 %v377_v5, %v3633_v31  ;;  %v389_v24 = vsel %vm315_vm0, %v3546_v45, 0 }
 0x119   : > { %v648_v27 = vsub.f32 %v3607_v63, %v647_v47  ;;  %v667_v7 = vand.u32 4294901760, %v3631_v38  ;;  %v3665_v5 = vand.u32 4294901760, %v386_v61  ;;  %v3667_v21 = vand.u32 4294901760, %v389_v24 }
 0x11a   : > { %4049 = vst [vmem:[#allocation19_spill] sm:$0xff] %v3637_v0  ;;  %v629_v9 = vand.u32 4294901760, %v628_v11  ;;  %v637_v48 = vand.u32 4294901760, %v3637_v0  ;;  %4051 = vst [vmem:[#allocation21_spill] sm:$0xff] %v3652_v19  ;;  %v3663_v11 = vsub.f32 %v383_v56, %v3642_v54  ;;  %v658_v63 = vsub.f32 %v3618_v10, %v657_v40 }
 0x11b   : > { %v668_v16 = vsub.f32 %v3631_v38, %v667_v7  ;;  %v687_v6 = vand.u32 4294901760, %v3652_v19  ;;  %v395_v56 = vsel %vm315_vm0, %v3574_v18, 0  ;;  %v313_v18 = vpop.trf.xlu1 }
 0x11c   : > { %2595 = vmatprep.mubr.f32.mxu1 %v629_v9  ;;  %2752 = vmatmul.mubr.f32.gmra.mrb[14].mxu0 %v637_v48  ;;  %v638_v55 = vsub.f32 %v3637_v0, %v637_v48  ;;  %4053 = vst [vmem:[#allocation23_spill] sm:$0xff] %v3663_v11  ;;  %v677_v9 = vand.u32 4294901760, %v3646_v28  ;;  %v392_v48 = vsel %vm315_vm0, %v3560_v62, 0  ;;  %v649_v0 = vand.u32 4294901760, %v648_v27 }
 0x11d   : > { %2754 = vmatprep.mubr.f32.mxu0 %v647_v47  ;;  %v3678_v47 = vsub.f32 %v386_v61, %v3665_v5  ;;  %v707_v10 = vand.u32 4294901760, %v3663_v11  ;;  %v3683_v62 = vsub.f32 %v389_v24, %v3667_v21  ;;  %v3685_v27 = vand.u32 4294901760, %v392_v48 }
 0x11e   : > { %v639_v45 = vand.u32 4294901760, %v638_v55  ;;  %v697_v55 = vand.u32 4294901760, %v3660_v23  ;;  %v659_v38 = vand.u32 4294901760, %v658_v63  ;;  %v678_v58 = vsub.f32 %v3646_v28, %v677_v9 }
 0x11f   : > { %4054 = vst [vmem:[#allocation24_spill] sm:$0xff] %v3683_v62  ;;  %v401_v61 = vsel %vm315_vm0, %v311_v37, 0  ;;  %v717_v63 = vand.u32 4294901760, %v3678_v47  ;;  %v708_v28 = vsub.f32 %v3663_v11, %v707_v10  ;;  %v3698_v46 = vsub.f32 %v392_v48, %v3685_v27  ;;  %v314_v11 = vpop.trf.xlu1 }
 0x120   : > { %2596 = vmatmul.mubr.f32.gmra.mrb[14].mxu1 %v639_v45  ;;  %2755 = vmatmul.mubr.f32.gmra.mrb[16].mxu0 %v657_v40  ;;  %v3688_v45 = vand.u32 4294901760, %v395_v56  ;;  %v398_v40 = vsel %vm315_vm0, %v3596_v51, 0  ;;  %v698_v24 = vsub.f32 %v3660_v23, %v697_v55  ;;  %v679_v51 = vand.u32 4294901760, %v678_v58 }
 0x121   : > { %2598 = vmatprep.mubr.f32.mxu1 %v649_v0  ;;  %2757 = vmatprep.mubr.f32.mxu0 %v667_v7  ;;  %v669_v0 = vand.u32 4294901760, %v668_v16  ;;  %v688_v7 = vsub.f32 %v3652_v19, %v687_v6  ;;  %v3700_v32 = vand.u32 4294901760, %v398_v40  ;;  %v727_v16 = vand.u32 4294901760, %v3683_v62 }
 0x122   : > { %v3704_v37 = vsub.f32 %v395_v56, %v3688_v45  ;;  %v699_v48 = vand.u32 4294901760, %v698_v24  ;;  %v709_v23 = vand.u32 4294901760, %v708_v28  ;;  %v718_v58 = vsub.f32 %v3678_v47, %v717_v63 }
 0x123   : > { %v3712_v19 = vsub.f32 %v398_v40, %v3700_v32  ;;  %v737_v20 = vand.u32 4294901760, %v3698_v46 }
 0x124   : > { %2599 = vmatmul.mubr.f32.gmra.mrb[16].mxu1 %v659_v38  ;;  %2758 = vmatmul.mubr.f32.gmra.mrb[18].mxu0 %v677_v9  ;;  %v3706_v38 = vand.u32 4294901760, %v401_v61  ;;  %v689_v9 = vand.u32 4294901760, %v688_v7  ;;  %v747_v28 = vand.u32 4294901760, %v3704_v37  ;;  %v719_v40 = vand.u32 4294901760, %v718_v58 }
 0x125   : > { %2601 = vmatprep.mubr.f32.mxu1 %v669_v0  ;;  %2760 = vmatprep.mubr.f32.mxu0 %v687_v6  ;;  %v404_v6 = vsel %vm315_vm0, %v312_v43, 0  ;;  %v407_v0 = vsel %vm315_vm0, %v313_v18, 0  ;;  %v728_v43 = vsub.f32 %v3683_v62, %v727_v16 }
 0x126   : > { %v3714_v56 = vand.u32 4294901760, %v404_v6  ;;  %v3721_v18 = vand.u32 4294901760, %v407_v0  ;;  %v748_v62 = vsub.f32 %v3704_v37, %v747_v28 }
 0x128   : > { %2602 = vmatmul.mubr.f32.gmra.mrb[18].mxu1 %v679_v51  ;;  %2761 = vmatmul.mubr.f32.gmra.mrb[20].mxu0 %v697_v55  ;;  %v3719_v55 = vsub.f32 %v401_v61, %v3706_v38  ;;  %v3726_v7 = vsub.f32 %v404_v6, %v3714_v56  ;;  %v738_v51 = vsub.f32 %v3698_v46, %v737_v20  ;;  %v757_v61 = vand.u32 4294901760, %v3712_v19 }
 0x129   : > { %2604 = vmatprep.mubr.f32.mxu1 %v689_v9  ;;  %2763 = vmatprep.mubr.f32.mxu0 %v707_v10  ;;  %v410_v10 = vsel %vm315_vm0, %v314_v11, 0  ;;  %v3733_v9 = vsub.f32 %v407_v0, %v3721_v18  ;;  %v729_v11 = vand.u32 4294901760, %v728_v43  ;;  %v749_v58 = vand.u32 4294901760, %v748_v62 }
 0x12a   : > { %4055 = vst [vmem:[#allocation25_spill] sm:$0xff] %v3719_v55  ;;  %v3728_v24 = vand.u32 4294901760, %v410_v10  ;;  %v758_v6 = vsub.f32 %v3712_v19, %v757_v61 }
 0x12b   : > { %v787_v43 = vand.u32 4294901760, %v3733_v9 }
 0x12c   : > { %2605 = vmatmul.mubr.f32.gmra.mrb[20].mxu1 %v699_v48  ;;  %2764 = vmatmul.mubr.f32.gmra.mrb[22].mxu0 %v717_v63  ;;  %v767_v63 = vand.u32 4294901760, %v3719_v55  ;;  %v777_v48 = vand.u32 4294901760, %v3726_v7 }
 0x12d   : > { %2607 = vmatprep.mubr.f32.mxu1 %v709_v23  ;;  %2766 = vmatprep.mubr.f32.mxu0 %v727_v16  ;;  %v3738_v23 = vsub.f32 %v410_v10, %v3728_v24  ;;  %v739_v16 = vand.u32 4294901760, %v738_v51  ;;  %v788_v51 = vsub.f32 %v3733_v9, %v787_v43 }
 0x12e   : > { %v768_v0 = vsub.f32 %v3719_v55, %v767_v63 }
 0x12f   : > { %v797_v10 = vand.u32 4294901760, %v3738_v23  ;;  %v789_v55 = vand.u32 4294901760, %v788_v51 }
 0x130   : > { %2608 = vmatmul.mubr.f32.gmra.mrb[22].mxu1 %v719_v40  ;;  %2767 = vmatmul.mubr.f32.gmra.mrb[24].mxu0 %v737_v20  ;;  %v759_v20 = vand.u32 4294901760, %v758_v6  ;;  %v769_v40 = vand.u32 4294901760, %v768_v0 }
 0x131   : > { %2610 = vmatprep.mubr.f32.mxu1 %v729_v11  ;;  %2769 = vmatprep.mubr.f32.mxu0 %v747_v28  ;;  %v778_v28 = vsub.f32 %v3726_v7, %v777_v48  ;;  %v798_v11 = vsub.f32 %v3738_v23, %v797_v10 }
 0x133   : > { %v779_v62 = vand.u32 4294901760, %v778_v28 }
 0x134   : > { %2611 = vmatmul.mubr.f32.gmra.mrb[24].mxu1 %v739_v16  ;;  %2770 = vmatmul.mubr.f32.gmra.mrb[26].mxu0 %v757_v61  ;;  %v799_v61 = vand.u32 4294901760, %v798_v11 }
 0x135   : > { %2613 = vmatprep.mubr.f32.mxu1 %v749_v58  ;;  %2772 = vmatprep.mubr.f32.mxu0 %v767_v63 }
 0x138   : > { %2614 = vmatmul.mubr.f32.gmra.mrb[26].mxu1 %v759_v20  ;;  %2773 = vmatmul.mubr.f32.gmra.mrb[28].mxu0 %v777_v48 }
 0x139   : > { %2616 = vmatprep.mubr.f32.mxu1 %v769_v40  ;;  %2775 = vmatprep.mubr.f32.mxu0 %v787_v43 }
 0x13c   : > { %2617 = vmatmul.mubr.f32.gmra.mrb[28].mxu1 %v779_v62  ;;  %2776 = vmatmul.mubr.f32.gmra.mrb[30].mxu0 %v797_v10 }
 0x13d   : > { %2619 = vmatprep.mubr.f32.mxu1 %v789_v55  ;;  %2782 = vmatprep.mubr.f32.mxu0 %v3457_v29 }
 0x140   : > { %2620 = vmatmul.mubr.f32.gmra.mrb[30].mxu1 %v799_v61  ;;  %2783 = vmatmul.mubr.f32.vlgmr.msra.gmra.mrb[0].mxu0 %v3465_v34 }
 0x141   : > { %2626 = vmatprep.mubr.f32.mxu1 %v3457_v29  ;;  %2785 = vmatprep.mubr.f32.mxu0 %v3475_v41 }
 0x142   : > { %2905 = vmatpush3.bf16.xpose.msra.mxu0 %v3446_v12  ;;  %v4056_v12 = vld [vmem:[#allocation8_spill] sm:$0xff] }
 0x144   : > { %2627 = vmatmul.mubr.f32.vlgmr.msra.gmra.mrb[0].mxu1 %v3465_v34  ;;  %2786 = vmatmul.mubr.f32.gmra.mrb[2].mxu0 %v3485_v49 }
 0x145   : > { %2893 = vmatpush3.bf16.xpose.msra.mxu1 %v3452_v25  ;;  %2629 = vmatprep.mubr.f32.mxu1 %v3475_v41  ;;  %v4057_v25 = vld [vmem:[#allocation9_spill] sm:$0xff] }
 0x146   : > { %2788 = vmatprep.mubr.f32.mxu0 %v3496_v57 }
 0x148   : > { %2630 = vmatmul.mubr.f32.gmra.mrb[2].mxu1 %v3485_v49  ;;  %2789 = vmatmul.mubr.f32.gmra.mrb[4].mxu0 %v3507_v1 }
 0x149   : > { %2632 = vmatprep.mubr.f32.mxu1 %v3496_v57  ;;  %2791 = vmatprep.mubr.f32.mxu0 %v3515_v8 }
 0x14c   : > { %2633 = vmatmul.mubr.f32.gmra.mrb[4].mxu1 %v3507_v1  ;;  %2792 = vmatmul.mubr.f32.gmra.mrb[6].mxu0 %v3525_v17 }
 0x14d   : > { %2635 = vmatprep.mubr.f32.mxu1 %v3515_v8  ;;  %2794 = vmatprep.mubr.f32.mxu0 %v3535_v26 }
 0x150   : > { %2636 = vmatmul.mubr.f32.gmra.mrb[6].mxu1 %v3525_v17  ;;  %2795 = vmatmul.mubr.f32.gmra.mrb[8].mxu0 %v3543_v39 }
 0x151   : > { %2638 = vmatprep.mubr.f32.mxu1 %v3535_v26  ;;  %2797 = vmatprep.mubr.f32.mxu0 %v3553_v53 }
 0x154   : > { %2639 = vmatmul.mubr.f32.gmra.mrb[8].mxu1 %v3543_v39  ;;  %2798 = vmatmul.mubr.f32.gmra.mrb[10].mxu0 %v3563_v2 }
 0x155   : > { %2641 = vmatprep.mubr.f32.mxu1 %v3553_v53  ;;  %2800 = vmatprep.mubr.f32.mxu0 %v3571_v14 }
 0x158   : > { %2642 = vmatmul.mubr.f32.gmra.mrb[10].mxu1 %v3563_v2  ;;  %2801 = vmatmul.mubr.f32.gmra.mrb[12].mxu0 %v3585_v35 }
 0x159   : > { %2644 = vmatprep.mubr.f32.mxu1 %v3571_v14  ;;  %2803 = vmatprep.mubr.f32.mxu0 %v3603_v59 }
 0x15c   : > { %2645 = vmatmul.mubr.f32.gmra.mrb[12].mxu1 %v3585_v35  ;;  %2804 = vmatmul.mubr.f32.gmra.mrb[14].mxu0 %v3627_v22 }
 0x15d   : > { %2647 = vmatprep.mubr.f32.mxu1 %v3603_v59  ;;  %2806 = vmatprep.mubr.f32.mxu0 %v3588_v42 }
 0x160   : > { %2648 = vmatmul.mubr.f32.gmra.mrb[14].mxu1 %v3627_v22  ;;  %2807 = vmatmul.mubr.f32.gmra.mrb[16].mxu0 %v3598_v33 }
 0x161   : > { %2650 = vmatprep.mubr.f32.mxu1 %v3588_v42  ;;  %2809 = vmatprep.mubr.f32.mxu0 %v3609_v3 }
 0x164   : > { %2651 = vmatmul.mubr.f32.gmra.mrb[16].mxu1 %v3598_v33  ;;  %2810 = vmatmul.mubr.f32.gmra.mrb[18].mxu0 %v3620_v15 }
 0x165   : > { %2653 = vmatprep.mubr.f32.mxu1 %v3609_v3  ;;  %2812 = vmatprep.mubr.f32.mxu0 %v3633_v31 }
 0x168   : > { %2654 = vmatmul.mubr.f32.gmra.mrb[18].mxu1 %v3620_v15  ;;  %2813 = vmatmul.mubr.f32.gmra.mrb[20].mxu0 %v3640_v50 }
 0x169   : > { %2656 = vmatprep.mubr.f32.mxu1 %v3633_v31  ;;  %2815 = vmatprep.mubr.f32.mxu0 %v3642_v54 }
 0x16c   : > { %2657 = vmatmul.mubr.f32.gmra.mrb[20].mxu1 %v3640_v50  ;;  %2816 = vmatmul.mubr.f32.gmra.mrb[22].mxu0 %v3665_v5 }
 0x16d   : > { %2659 = vmatprep.mubr.f32.mxu1 %v3642_v54  ;;  %2818 = vmatprep.mubr.f32.mxu0 %v3667_v21 }
 0x170   : > { %2660 = vmatmul.mubr.f32.gmra.mrb[22].mxu1 %v3665_v5  ;;  %2819 = vmatmul.mubr.f32.gmra.mrb[24].mxu0 %v3685_v27 }
 0x171   : > { %2662 = vmatprep.mubr.f32.mxu1 %v3667_v21  ;;  %2821 = vmatprep.mubr.f32.mxu0 %v3688_v45 }
 0x174   : > { %2663 = vmatmul.mubr.f32.gmra.mrb[24].mxu1 %v3685_v27  ;;  %2822 = vmatmul.mubr.f32.gmra.mrb[26].mxu0 %v3700_v32 }
 0x175   : > { %2665 = vmatprep.mubr.f32.mxu1 %v3688_v45  ;;  %2824 = vmatprep.mubr.f32.mxu0 %v3706_v38 }
 0x178   : > { %2666 = vmatmul.mubr.f32.gmra.mrb[26].mxu1 %v3700_v32  ;;  %2825 = vmatmul.mubr.f32.gmra.mrb[28].mxu0 %v3714_v56 }
 0x179   : > { %2668 = vmatprep.mubr.f32.mxu1 %v3706_v38  ;;  %2827 = vmatprep.mubr.f32.mxu0 %v3721_v18 }
 0x17c   : > { %2669 = vmatmul.mubr.f32.gmra.mrb[28].mxu1 %v3714_v56  ;;  %2828 = vmatmul.mubr.f32.gmra.mrb[30].mxu0 %v3728_v24 }
 0x17d   : > { %2671 = vmatprep.mubr.f32.mxu1 %v3721_v18  ;;  %2834 = vmatprep.mubr.f32.mxu0 %v3457_v29  ;;  %v4058_v29 = vld [vmem:[#allocation10_spill] sm:$0xff] }
 0x180   : > { %2672 = vmatmul.mubr.f32.gmra.mrb[30].mxu1 %v3728_v24  ;;  %2835 = vmatmul.mubr.f32.vlgmr.msra.gmra.mrb[0].mxu0 %v3465_v34  ;;  %v4060_v34 = vld [vmem:[#allocation12_spill] sm:$0xff] }
 0x181   : > { %2678 = vmatprep.mubr.f32.mxu1 %v3460_v30  ;;  %2837 = vmatprep.mubr.f32.mxu0 %v3475_v41  ;;  %v4059_v30 = vld [vmem:[#allocation11_spill] sm:$0xff]  ;;  %v4062_v41 = vld [vmem:[#allocation14_spill] sm:$0xff] }
 0x184   : > { %2679 = vmatmul.mubr.f32.vlgmr.msra.gmra.mrb[0].mxu1 %v3469_v36  ;;  %2838 = vmatmul.mubr.f32.gmra.mrb[2].mxu0 %v3485_v49  ;;  %v4061_v36 = vld [vmem:[#allocation13_spill] sm:$0xff]  ;;  %v4064_v49 = vld [vmem:[#allocation19_spill] sm:$0xff] }
 0x185   : > { %2681 = vmatprep.mubr.f32.mxu1 %v3479_v44  ;;  %2840 = vmatprep.mubr.f32.mxu0 %v3496_v57  ;;  %v4063_v44 = vld [vmem:[#allocation16_spill] sm:$0xff]  ;;  %v4066_v57 = vld [vmem:[#allocation17_spill] sm:$0xff] }
 0x188   : > { %2682 = vmatmul.mubr.f32.gmra.mrb[2].mxu1 %v3490_v52  ;;  %2841 = vmatmul.mubr.f32.gmra.mrb[4].mxu0 %v3507_v1  ;;  %v4065_v52 = vld [vmem:[#allocation15_spill] sm:$0xff]  ;;  %v4068_v1 = vld [vmem:[#allocation20_spill] sm:$0xff] }
 0x189   : > { %2684 = vmatprep.mubr.f32.mxu1 %v3501_v60  ;;  %2843 = vmatprep.mubr.f32.mxu0 %v3515_v8  ;;  %v4067_v60 = vld [vmem:[#allocation18_spill] sm:$0xff] }
 0x18a   : > { %v4070_v8 = vld [vmem:[#allocation22_spill] sm:$0xff] }
 0x18c   : > { %2685 = vmatmul.mubr.f32.gmra.mrb[4].mxu1 %v3511_v4  ;;  %2844 = vmatmul.mubr.f32.gmra.mrb[6].mxu0 %v3525_v17  ;;  %v4069_v4 = vld [vmem:[#allocation21_spill] sm:$0xff]  ;;  %v4072_v17 = vld [vmem:[#allocation24_spill] sm:$0xff] }
 0x18d   : > { %2687 = vmatprep.mubr.f32.mxu1 %v3521_v13  ;;  %2846 = vmatprep.mubr.f32.mxu0 %v3535_v26  ;;  %v4071_v13 = vld [vmem:[#allocation23_spill] sm:$0xff]  ;;  %v4073_v26 = vld [vmem:[#allocation25_spill] sm:$0xff] }
 0x190   : > { %2688 = vmatmul.mubr.f32.gmra.mrb[6].mxu1 %v4056_v12  ;;  %2847 = vmatmul.mubr.f32.gmra.mrb[8].mxu0 %v3543_v39 }
 0x191   : > { %2690 = vmatprep.mubr.f32.mxu1 %v4057_v25  ;;  %2849 = vmatprep.mubr.f32.mxu0 %v3553_v53 }
 0x194   : > { %2691 = vmatmul.mubr.f32.gmra.mrb[8].mxu1 %v4058_v29  ;;  %2850 = vmatmul.mubr.f32.gmra.mrb[10].mxu0 %v3563_v2 }
 0x195   : > { %2693 = vmatprep.mubr.f32.mxu1 %v4059_v30  ;;  %2852 = vmatprep.mubr.f32.mxu0 %v3571_v14 }
 0x198   : > { %2694 = vmatmul.mubr.f32.gmra.mrb[10].mxu1 %v4060_v34  ;;  %2853 = vmatmul.mubr.f32.gmra.mrb[12].mxu0 %v3585_v35 }
 0x199   : > { %2696 = vmatprep.mubr.f32.mxu1 %v4061_v36  ;;  %2855 = vmatprep.mubr.f32.mxu0 %v3603_v59 }
 0x19c   : > { %2697 = vmatmul.mubr.f32.gmra.mrb[12].mxu1 %v4062_v41  ;;  %2856 = vmatmul.mubr.f32.gmra.mrb[14].mxu0 %v3627_v22 }
 0x19d   : > { %2699 = vmatprep.mubr.f32.mxu1 %v4063_v44  ;;  %2858 = vmatprep.mubr.f32.mxu0 %v3588_v42 }
 0x1a0   : > { %2700 = vmatmul.mubr.f32.gmra.mrb[14].mxu1 %v4064_v49  ;;  %2859 = vmatmul.mubr.f32.gmra.mrb[16].mxu0 %v3598_v33 }
 0x1a1   : > { %2702 = vmatprep.mubr.f32.mxu1 %v4065_v52  ;;  %2861 = vmatprep.mubr.f32.mxu0 %v3609_v3 }
 0x1a4   : > { %2703 = vmatmul.mubr.f32.gmra.mrb[16].mxu1 %v4066_v57  ;;  %2862 = vmatmul.mubr.f32.gmra.mrb[18].mxu0 %v3620_v15 }
 0x1a5   : > { %2705 = vmatprep.mubr.f32.mxu1 %v4067_v60  ;;  %2864 = vmatprep.mubr.f32.mxu0 %v3633_v31 }
 0x1a8   : > { %2706 = vmatmul.mubr.f32.gmra.mrb[18].mxu1 %v4068_v1  ;;  %2865 = vmatmul.mubr.f32.gmra.mrb[20].mxu0 %v3640_v50 }
 0x1a9   : > { %2708 = vmatprep.mubr.f32.mxu1 %v4069_v4  ;;  %2867 = vmatprep.mubr.f32.mxu0 %v3642_v54 }
 0x1ac   : > { %2709 = vmatmul.mubr.f32.gmra.mrb[20].mxu1 %v4070_v8  ;;  %2868 = vmatmul.mubr.f32.gmra.mrb[22].mxu0 %v3665_v5 }
 0x1ad   : > { %2711 = vmatprep.mubr.f32.mxu1 %v4071_v13  ;;  %2870 = vmatprep.mubr.f32.mxu0 %v3667_v21 }
 0x1b0   : > { %2712 = vmatmul.mubr.f32.gmra.mrb[22].mxu1 %v3678_v47  ;;  %2871 = vmatmul.mubr.f32.gmra.mrb[24].mxu0 %v3685_v27 }
 0x1b1   : > { %2714 = vmatprep.mubr.f32.mxu1 %v4072_v17  ;;  %2873 = vmatprep.mubr.f32.mxu0 %v3688_v45 }
 0x1b4   : > { %2715 = vmatmul.mubr.f32.gmra.mrb[24].mxu1 %v3698_v46  ;;  %2874 = vmatmul.mubr.f32.gmra.mrb[26].mxu0 %v3700_v32  ;;  %v3883_v46 = vld [vmem:[%s4006_s2] ss:$0 sm:$0xff] }
 0x1b5   : > { %2717 = vmatprep.mubr.f32.mxu1 %v3704_v37  ;;  %2876 = vmatprep.mubr.f32.mxu0 %v3706_v38 }
 0x1b8   : > { %2718 = vmatmul.mubr.f32.gmra.mrb[26].mxu1 %v3712_v19  ;;  %2877 = vmatmul.mubr.f32.gmra.mrb[28].mxu0 %v3714_v56 }
 0x1b9   : > { %2720 = vmatprep.mubr.f32.mxu1 %v4073_v26  ;;  %2879 = vmatprep.mubr.f32.mxu0 %v3721_v18 }
 0x1bc   : > { %2721 = vmatmul.mubr.f32.gmra.mrb[28].mxu1 %v3726_v7  ;;  %2880 = vmatmul.mubr.f32.gmra.mrb[30].mxu0 %v3728_v24 }
 0x1bd   : > { %2723 = vmatprep.mubr.f32.mxu1 %v3733_v9 }
 0x1c0   : > { %2724 = vmatmul.mubr.f32.gmra.mrb[30].mxu1 %v3738_v23 }
 0x253   : > { %v2836_v32 = vpop.f32.mrb[0].mxu0 }
 0x254   : > { %v2020_v39 = vpop.f32.mrb[1].mxu0 }
 0x257   : > { %v2680_v53 = vpop.f32.mrb[0].mxu1  ;;  %v2839_v2 = vpop.f32.mrb[2].mxu0 }
 0x258   : > { %v2906_v14 = vadd.f32 %v2680_v53, %v3883_v46  ;;  %v1144_v21 = vpop.f32.mrb[1].mxu1  ;;  %v2032_v35 = vpop.f32.mrb[3].mxu0 }
 0x259   : > { %v2908_v42 = vadd.f32 %v3883_v46, %v1144_v21 }
 0x25a   : > { %v2907_v33 = vadd.f32 %v2906_v14, %v2836_v32 }
 0x25b   : > { %v2909_v59 = vadd.f32 %v2908_v42, %v2020_v39  ;;  %v2683_v3 = vpop.f32.mrb[2].mxu1  ;;  %v2842_v15 = vpop.f32.mrb[4].mxu0 }
 0x25c   : > { %2212 = vst.msk [vmem:[%s3889_s4 + $0x8] sm:$0xff] %vm2210_vm1, %v2907_v33  ;;  %v2910_v22 = vadd.f32 %v2683_v3, %v3883_v46  ;;  %v1158_v31 = vpop.f32.mrb[3].mxu1  ;;  %v2044_v50 = vpop.f32.mrb[5].mxu0 }
 0x25d   : > { %2211 = vst.msk [vmem:[%s3889_s4] sm:$0xff] %vm2210_vm1, %v2909_v59  ;;  %v2912_v54 = vadd.f32 %v3883_v46, %v1158_v31 }
 0x25e   : > { %v2911_v19 = vadd.f32 %v2910_v22, %v2839_v2 }
 0x25f   : > { %v2913_v5 = vadd.f32 %v2912_v54, %v2032_v35  ;;  %v2686_v47 = vpop.f32.mrb[4].mxu1  ;;  %v2845_v27 = vpop.f32.mrb[6].mxu0 }
 0x260   : > { %2214 = vst.msk [vmem:[%s3889_s4 + $0x18] sm:$0xff] %vm2210_vm1, %v2911_v19  ;;  %v2914_v45 = vadd.f32 %v2686_v47, %v3883_v46  ;;  %v1172_v37 = vpop.f32.mrb[5].mxu1  ;;  %v2056_v38 = vpop.f32.mrb[7].mxu0 }
 0x261   : > { %2213 = vst.msk [vmem:[%s3889_s4 + $0x10] sm:$0xff] %vm2210_vm1, %v2913_v5  ;;  %v2916_v56 = vadd.f32 %v3883_v46, %v1172_v37 }
 0x262   : > { %v2915_v55 = vadd.f32 %v2914_v45, %v2842_v15 }
 0x263   : > { %v2917_v18 = vadd.f32 %v2916_v56, %v2044_v50  ;;  %v2689_v7 = vpop.f32.mrb[6].mxu1  ;;  %v2848_v24 = vpop.f32.mrb[8].mxu0 }
 0x264   : > { %2216 = vst.msk [vmem:[%s3889_s4 + $0x28] sm:$0xff] %vm2210_vm1, %v2915_v55  ;;  %v2918_v9 = vadd.f32 %v2689_v7, %v3883_v46  ;;  %v1186_v63 = vpop.f32.mrb[7].mxu1  ;;  %v2068_v23 = vpop.f32.mrb[9].mxu0 }
 0x265   : > { %2215 = vst.msk [vmem:[%s3889_s4 + $0x20] sm:$0xff] %vm2210_vm1, %v2917_v18  ;;  %v2920_v16 = vadd.f32 %v3883_v46, %v1186_v63 }
 0x266   : > { %v2919_v6 = vadd.f32 %v2918_v9, %v2845_v27 }
 0x267   : > { %v2921_v48 = vadd.f32 %v2920_v16, %v2056_v38  ;;  %v2692_v58 = vpop.f32.mrb[8].mxu1  ;;  %v2851_v0 = vpop.f32.mrb[10].mxu0 }
 0x268   : > { %2218 = vst.msk [vmem:[%s3889_s4 + $0x38] sm:$0xff] %vm2210_vm1, %v2919_v6  ;;  %v2922_v43 = vadd.f32 %v2692_v58, %v3883_v46  ;;  %v1200_v20 = vpop.f32.mrb[9].mxu1  ;;  %v2080_v28 = vpop.f32.mrb[11].mxu0 }
 0x269   : > { %2217 = vst.msk [vmem:[%s3889_s4 + $0x30] sm:$0xff] %vm2210_vm1, %v2921_v48  ;;  %v2924_v10 = vadd.f32 %v3883_v46, %v1200_v20 }
 0x26a   : > { %v2923_v40 = vadd.f32 %v2922_v43, %v2848_v24 }
 0x26b   : > { %v2925_v51 = vadd.f32 %v2924_v10, %v2068_v23  ;;  %v2695_v62 = vpop.f32.mrb[10].mxu1  ;;  %v2854_v11 = vpop.f32.mrb[12].mxu0 }
 0x26c   : > { %2220 = vst.msk [vmem:[%s3889_s4 + $0x48] sm:$0xff] %vm2210_vm1, %v2923_v40  ;;  %v2926_v61 = vadd.f32 %v2695_v62, %v3883_v46  ;;  %v1214_v12 = vpop.f32.mrb[11].mxu1  ;;  %v2092_v25 = vpop.f32.mrb[13].mxu0 }
 0x26d   : > { %2219 = vst.msk [vmem:[%s3889_s4 + $0x40] sm:$0xff] %vm2210_vm1, %v2925_v51  ;;  %v2928_v29 = vadd.f32 %v3883_v46, %v1214_v12 }
 0x26e   : > { %v2927_v30 = vadd.f32 %v2926_v61, %v2851_v0 }
 0x26f   : > { %v2929_v34 = vadd.f32 %v2928_v29, %v2080_v28  ;;  %v2698_v36 = vpop.f32.mrb[12].mxu1  ;;  %v2857_v41 = vpop.f32.mrb[14].mxu0 }
 0x270   : > { %2222 = vst.msk [vmem:[%s3889_s4 + $0x58] sm:$0xff] %vm2210_vm1, %v2927_v30  ;;  %v2930_v44 = vadd.f32 %v2698_v36, %v3883_v46  ;;  %v1228_v49 = vpop.f32.mrb[13].mxu1  ;;  %v2104_v52 = vpop.f32.mrb[15].mxu0 }
 0x271   : > { %2221 = vst.msk [vmem:[%s3889_s4 + $0x50] sm:$0xff] %vm2210_vm1, %v2929_v34  ;;  %v2932_v57 = vadd.f32 %v3883_v46, %v1228_v49 }
 0x272   : > { %v2931_v60 = vadd.f32 %v2930_v44, %v2854_v11 }
 0x273   : > { %v2933_v1 = vadd.f32 %v2932_v57, %v2092_v25  ;;  %v2701_v4 = vpop.f32.mrb[14].mxu1  ;;  %v2860_v8 = vpop.f32.mrb[16].mxu0 }
 0x274   : > { %2224 = vst.msk [vmem:[%s3889_s4 + $0x68] sm:$0xff] %vm2210_vm1, %v2931_v60  ;;  %v2934_v13 = vadd.f32 %v2701_v4, %v3883_v46  ;;  %v1242_v17 = vpop.f32.mrb[15].mxu1  ;;  %v2116_v26 = vpop.f32.mrb[17].mxu0 }
 0x275   : > { %2223 = vst.msk [vmem:[%s3889_s4 + $0x60] sm:$0xff] %vm2210_vm1, %v2933_v1  ;;  %v2936_v32 = vadd.f32 %v3883_v46, %v1242_v17 }
 0x276   : > { %v2935_v39 = vadd.f32 %v2934_v13, %v2857_v41 }
 0x277   : > { %v2937_v53 = vadd.f32 %v2936_v32, %v2104_v52  ;;  %v2704_v2 = vpop.f32.mrb[16].mxu1  ;;  %v2863_v14 = vpop.f32.mrb[18].mxu0 }
 0x278   : > { %2226 = vst.msk [vmem:[%s3889_s4 + $0x78] sm:$0xff] %vm2210_vm1, %v2935_v39  ;;  %v2938_v21 = vadd.f32 %v2704_v2, %v3883_v46  ;;  %v1256_v35 = vpop.f32.mrb[17].mxu1  ;;  %v2128_v42 = vpop.f32.mrb[19].mxu0 }
 0x279   : > { %2225 = vst.msk [vmem:[%s3889_s4 + $0x70] sm:$0xff] %vm2210_vm1, %v2937_v53  ;;  %v2940_v33 = vadd.f32 %v3883_v46, %v1256_v35 }
 0x27a   : > { %v2939_v59 = vadd.f32 %v2938_v21, %v2860_v8 }
 0x27b   : > { %v2941_v3 = vadd.f32 %v2940_v33, %v2116_v26  ;;  %v2707_v15 = vpop.f32.mrb[18].mxu1  ;;  %v2866_v22 = vpop.f32.mrb[20].mxu0 }
 0x27c   : > { %2228 = vst.msk [vmem:[%s3889_s4 + $0x88] sm:$0xff] %vm2210_vm1, %v2939_v59  ;;  %v2942_v31 = vadd.f32 %v2707_v15, %v3883_v46  ;;  %v1270_v50 = vpop.f32.mrb[19].mxu1  ;;  %v2140_v54 = vpop.f32.mrb[21].mxu0 }
 0x27d   : > { %2227 = vst.msk [vmem:[%s3889_s4 + $0x80] sm:$0xff] %vm2210_vm1, %v2941_v3  ;;  %v2944_v19 = vadd.f32 %v3883_v46, %v1270_v50 }
 0x27e   : > { %v2943_v5 = vadd.f32 %v2942_v31, %v2863_v14 }
 0x27f   : > { %v2945_v47 = vadd.f32 %v2944_v19, %v2128_v42  ;;  %v2710_v27 = vpop.f32.mrb[20].mxu1  ;;  %v2869_v45 = vpop.f32.mrb[22].mxu0 }
 0x280   : > { %2230 = vst.msk [vmem:[%s3889_s4 + $0x98] sm:$0xff] %vm2210_vm1, %v2943_v5  ;;  %v2946_v37 = vadd.f32 %v2710_v27, %v3883_v46  ;;  %v1284_v38 = vpop.f32.mrb[21].mxu1  ;;  %v2152_v56 = vpop.f32.mrb[23].mxu0 }
 0x281   : > { %2229 = vst.msk [vmem:[%s3889_s4 + $0x90] sm:$0xff] %vm2210_vm1, %v2945_v47  ;;  %v2948_v55 = vadd.f32 %v3883_v46, %v1284_v38 }
 0x282   : > { %v2947_v18 = vadd.f32 %v2946_v37, %v2866_v22 }
 0x283   : > { %v2949_v7 = vadd.f32 %v2948_v55, %v2140_v54  ;;  %v2713_v24 = vpop.f32.mrb[22].mxu1  ;;  %v2872_v9 = vpop.f32.mrb[24].mxu0 }
 0x284   : > { %2232 = vst.msk [vmem:[%s3889_s4 + $0xa8] sm:$0xff] %vm2210_vm1, %v2947_v18  ;;  %v2950_v63 = vadd.f32 %v2713_v24, %v3883_v46  ;;  %v1298_v23 = vpop.f32.mrb[23].mxu1  ;;  %v2164_v16 = vpop.f32.mrb[25].mxu0 }
 0x285   : > { %2231 = vst.msk [vmem:[%s3889_s4 + $0xa0] sm:$0xff] %vm2210_vm1, %v2949_v7  ;;  %v2952_v6 = vadd.f32 %v3883_v46, %v1298_v23 }
 0x286   : > { %v2951_v48 = vadd.f32 %v2950_v63, %v2869_v45 }
 0x287   : > { %v2953_v58 = vadd.f32 %v2952_v6, %v2152_v56  ;;  %v2716_v0 = vpop.f32.mrb[24].mxu1  ;;  %v2875_v43 = vpop.f32.mrb[26].mxu0 }
 0x288   : > { %2234 = vst.msk [vmem:[%s3889_s4 + $0xb8] sm:$0xff] %vm2210_vm1, %v2951_v48  ;;  %v2954_v20 = vadd.f32 %v2716_v0, %v3883_v46  ;;  %v1312_v28 = vpop.f32.mrb[25].mxu1  ;;  %v2176_v10 = vpop.f32.mrb[27].mxu0 }
 0x289   : > { %2233 = vst.msk [vmem:[%s3889_s4 + $0xb0] sm:$0xff] %vm2210_vm1, %v2953_v58  ;;  %v2956_v40 = vadd.f32 %v3883_v46, %v1312_v28 }
 0x28a   : > { %v2955_v51 = vadd.f32 %v2954_v20, %v2872_v9 }
 0x28b   : > { %v2957_v62 = vadd.f32 %v2956_v40, %v2164_v16  ;;  %v2719_v11 = vpop.f32.mrb[26].mxu1  ;;  %v2878_v61 = vpop.f32.mrb[28].mxu0 }
 0x28c   : > { %2236 = vst.msk [vmem:[%s3889_s4 + $0xc8] sm:$0xff] %vm2210_vm1, %v2955_v51  ;;  %v2958_v12 = vadd.f32 %v2719_v11, %v3883_v46  ;;  %v1326_v25 = vpop.f32.mrb[27].mxu1  ;;  %v2188_v29 = vpop.f32.mrb[29].mxu0 }
 0x28d   : > { %2235 = vst.msk [vmem:[%s3889_s4 + $0xc0] sm:$0xff] %vm2210_vm1, %v2957_v62  ;;  %v2960_v30 = vadd.f32 %v3883_v46, %v1326_v25 }
 0x28e   : > { %v2959_v34 = vadd.f32 %v2958_v12, %v2875_v43 }
 0x28f   : > { %v2961_v36 = vadd.f32 %v2960_v30, %v2176_v10  ;;  %v2722_v41 = vpop.f32.mrb[28].mxu1  ;;  %v2881_v44 = vpop.f32.mrb[30].mxu0 }
 0x290   : > { %2238 = vst.msk [vmem:[%s3889_s4 + $0xd8] sm:$0xff] %vm2210_vm1, %v2959_v34  ;;  %v2962_v49 = vadd.f32 %v2722_v41, %v3883_v46  ;;  %v1340_v52 = vpop.f32.mrb[29].mxu1  ;;  %v2200_v57 = vpop.f32.mrb[31].mxu0 }
 0x291   : > { %2237 = vst.msk [vmem:[%s3889_s4 + $0xd0] sm:$0xff] %vm2210_vm1, %v2961_v36  ;;  %v2964_v60 = vadd.f32 %v3883_v46, %v1340_v52 }
 0x292   : > { %v2963_v1 = vadd.f32 %v2962_v49, %v2878_v61 }
 0x293   : > { %v2965_v4 = vadd.f32 %v2964_v60, %v2188_v29  ;;  %v2725_v8 = vpop.f32.mrb[30].mxu1 }
 0x294   : > { %2240 = vst.msk [vmem:[%s3889_s4 + $0xe8] sm:$0xff] %vm2210_vm1, %v2963_v1  ;;  %v2966_v13 = vadd.f32 %v2725_v8, %v3883_v46  ;;  %v1354_v17 = vpop.f32.mrb[31].mxu1 }
 0x295   : > { %2239 = vst.msk [vmem:[%s3889_s4 + $0xe0] sm:$0xff] %vm2210_vm1, %v2965_v4  ;;  %v2968_v26 = vadd.f32 %v3883_v46, %v1354_v17 }
 0x296   : > { %v2967_v32 = vadd.f32 %v2966_v13, %v2881_v44 }
 0x297   : > { %v2969_v39 = vadd.f32 %v2968_v26, %v2200_v57 }
 0x298   : > { %2242 = vst.msk [vmem:[%s3889_s4 + $0xf8] sm:$0xff] %vm2210_vm1, %v2967_v32 }
 0x299   : > { %2241 = vst.msk [vmem:[%s3889_s4 + $0xf0] sm:$0xff] %vm2210_vm1, %v2969_v39 }
 0x29a PF: > { %s17_s17 = sadd.s32 1, %s3281_s17   ;;  %s4074_s12 = smov %s3265_s13 }
 0x29b   : > { %p14_p1 = scmp.ge.s32.totalorder %s17_s17, 4   ;;  %s4075_s13 = smov %s3269_s14 }
 0x29c   : > { %s4076_s14 = smov %s3392_s27  ;;  %s4077_s15 = smov %s3277_s16 }
 0x29d   : > { %s4078_s16 = smov %s4080_s25  ;;  %16 = sbr.rel (!%p14_p1) target bundleno = 5 (0x5), region = 76 }
 0x2a4   :  { %2273 = vsyncpa [#allocation3], 1 }
 0x2a5   :  { %2275 = vsyncpa [#allocation3 + $0x1], 1 }
 0x2a6   :  { %2276 = vsyncpa [#allocation5], 1 }

</bundles_post_ra>
